<compile_context>
chip_gen: v5e
topology: v5e:2x2
jax: 0.10.0
libtpu: 0.0.40
codegen_flags: <defaults>
</compile_context>

<pallas_src>
import numpy as np
import jax
import jax.numpy as jnp
from jax.experimental import pallas as pl
from jax.experimental.pallas import tpu as pltpu


def _conv1d_matrix(w, l_in, l_out, kernel, stride, pad):
    """Single in/out channel Conv1d as y = x @ C (bias handled separately)."""
    c = np.zeros((l_in, l_out), dtype=np.float32)
    for j in range(l_out):
        for t in range(kernel):
            idx = j * stride + t - pad
            if 0 <= idx < l_in:
                c[idx, j] += float(w[t])
    return c


def _align8(x):
    return (x + 7) // 8 * 8


def _build_kernel(bsz, n, m, vocab, off):
    f32 = jnp.float32
    o_w1, o_cm, o_wh, o_em, o_rw = off["w1"], off["cm"], off["whh"], off["emb"], off["rows"]

    def kernel(a_ref, p_ref, o_ref):
        # ---- activations (packed in the wrapper: [st1 | zt | da | ht1]) ----
        x1 = a_ref[:, 0:2 * n]                  # [st1 | zt | da]  -> pass-1 input
        st1 = a_ref[:, 0:n]
        da_f = a_ref[:, 2 * n - 1:2 * n]        # (B, 1)
        ht1 = a_ref[:, 2 * n:2 * n + m]

        # ---- parameters (static slices of the single packed slab) ----
        W1 = p_ref[o_w1:o_w1 + 2 * n, 0:4 * m]      # block-diag(C1@C2, Cx@Wih.T)
        Cm = p_ref[o_cm:o_cm + 2 * m, 0:m]          # conv1d_mt1
        Whh = p_ref[o_wh:o_wh + m, 0:3 * m]         # GRU hidden projection
        emb = p_ref[o_em:o_em + vocab, 0:n]         # embedding table
        b1 = p_ref[o_rw + 0:o_rw + 1, 0:4 * m]      # [b12 | gi biases]
        bm = p_ref[o_rw + 1:o_rw + 2, 0:m]
        bhh = p_ref[o_rw + 2:o_rw + 3, 0:3 * m]
        wht = p_ref[o_rw + 3:o_rw + 4, 0:m]
        wct = p_ref[o_rw + 4:o_rw + 5, 0:m]
        b_ht = p_ref[o_rw + 5:o_rw + 6, 0:1]
        b_ct = p_ref[o_rw + 5:o_rw + 6, 1:2]
        w_ct_da = p_ref[o_rw + 5:o_rw + 6, 2:3]

        # ---- pass 1: Mt1_0 and the three GRU input-gate projections, fused ----
        y1 = jnp.dot(x1, W1, preferred_element_type=f32) + b1       # (B, 4m)
        mt1_0 = y1[:, 0:m]
        gi = y1[:, m:4 * m]                                          # [r | z | n]

        # ---- pass 2: Ht1 = conv1d_mt1(relu(cat[Mt1_0, ht1])), one MXU pass ----
        x2 = jnp.maximum(jnp.concatenate([mt1_0, ht1], axis=1), 0.0)
        Ht1 = jnp.dot(x2, Cm, preferred_element_type=f32) + bm       # (B, m)

        # ---- pass 3: GRU hidden-gate projections ----
        gh = jnp.dot(Ht1, Whh, preferred_element_type=f32) + bhh     # (B, 3m)

        r = jax.nn.sigmoid(gi[:, 0:m] + gh[:, 0:m])
        z = jax.nn.sigmoid(gi[:, m:2 * m] + gh[:, m:2 * m])
        ng = jnp.tanh(gi[:, 2 * m:3 * m] + r * gh[:, 2 * m:3 * m])
        ht = (1.0 - z) * ng + z * Ht1                                # (B, m)

        # ---- width-1 heads on the VPU (multiply + lane reduce, no MXU) ----
        logit = jnp.sum(ht * wht, axis=1, keepdims=True) + b_ht      # (B, 1)
        it = jnp.floor((vocab - 1) * jax.nn.sigmoid(logit)).astype(jnp.int32)
        ct = jax.nn.sigmoid(
            jnp.sum(jnp.maximum(ht, 0.0) * wct, axis=1, keepdims=True)
            + jnp.maximum(da_f, 0.0) * w_ct_da + b_ct)               # (B, 1)

        # ---- pass 4: srt = embedding(it) via exact one-hot matmul ----
        iota_v = jax.lax.broadcasted_iota(jnp.int32, (bsz, vocab), 1)
        onehot = (iota_v == it).astype(f32)                          # (B, V)
        srt = jnp.dot(onehot, emb, preferred_element_type=f32)       # (B, n)

        # ---- batched "shift st1 left by da, zero-fill": compare-select + lane reduce ----
        # shifted[b, j] = st1[b, j + da_b] if j + da_b < n else 0  (da >= n -> all zeros)
        da_i = da_f.astype(jnp.int32)                                # (B, 1)
        j3 = jax.lax.broadcasted_iota(jnp.int32, (bsz, n, n), 1)     # destination index
        k3 = jax.lax.broadcasted_iota(jnp.int32, (bsz, n, n), 2)     # source index
        sel = (k3 == j3 + da_i[:, :, None]).astype(f32)              # (B, n, n)
        shifted = jnp.sum(st1[:, None, :] * sel, axis=2)             # (B, n)

        st = shifted * ct + srt

        # ---- single lane-dense full-block store (st | ht packed) ----
        o_ref[...] = jnp.concatenate([st, ht], axis=1)

    return kernel


def generator_cell(params, st1, ht1, zt, da_t):
    n, m, vocab = params["n"], params["m"], params["vocab"]
    bsz = st1.shape[0]
    da_f = da_t.astype(jnp.float32).reshape(bsz, 1)
    # One activation slab; its first 2n columns are exactly the pass-1 input.
    acts = jnp.concatenate(
        [st1.astype(jnp.float32), zt.astype(jnp.float32), da_f,
         ht1.astype(jnp.float32)], axis=1)                           # (B, 2n+m)

    vmem = pl.BlockSpec(memory_space=pltpu.MemorySpace.VMEM)
    out = pl.pallas_call(
        _build_kernel(bsz, n, m, vocab, params["off"]),
        out_shape=jax.ShapeDtypeStruct((bsz, n + m), jnp.float32),
        in_specs=[vmem, vmem],
        out_specs=vmem,
    )(acts, params["pslab"])
    return out[:, :n], out[:, n:]


def make_params(n, m, vocab, seed=42):
    rng = np.random.default_rng(seed)

    def u(*shape):
        return rng.uniform(-0.3, 0.3, size=shape).astype(np.float32)

    w_conv1, b_conv1 = u(5), u()
    w_conv2, b_conv2 = u(2), u()
    w_convm, b_convm = u(3), u()
    w_convx, b_convx = u(2), u()
    wih, whh = u(3 * m, m), u(3 * m, m)
    bih, bhh = u(3 * m), u(3 * m)
    w_ht, b_ht = u(1, m), u()
    w_ct, b_ct = u(1, m + 1), u()
    emb = u(vocab, n)

    stride = round((n - 2) / (m - 1))
    assert (n - 2) // stride + 1 == m, "conv output length != m for these (n, m)"
    C1 = _conv1d_matrix(w_conv1, n, n, 5, 1, 2)
    C2 = _conv1d_matrix(w_conv2, n, m, 2, stride, 0)
    Cm = _conv1d_matrix(w_convm, 2 * m, m, 3, 2, 1)
    Cx = _conv1d_matrix(w_convx, n, m, 2, stride, 0)

    # Fold conv1 ∘ conv2 (Mt1_0) and conv_xt ∘ GRU-input projection (gi) offline.
    C12 = C1 @ C2                                                   # (n, m)
    b12 = float(b_conv1) * C2.sum(axis=0) + float(b_conv2)          # (m,)
    WihT = np.ascontiguousarray(wih.T)                              # (m, 3m)
    AD = Cx @ WihT                                                  # (n, 3m): rows = [zt | da]
    gib = float(b_convx) * WihT.sum(axis=0) + bih                   # (3m,)
    WhhT = np.ascontiguousarray(whh.T)                              # (m, 3m)

    # Block-diagonal fused pass-1 weight: [st1 | zt | da] (B,2n) @ W1 -> [Mt1_0 | gi]
    W1 = np.zeros((2 * n, 4 * m), np.float32)
    W1[:n, :m] = C12
    W1[n:, m:] = AD
    b1 = np.concatenate([b12, gib]).astype(np.float32)              # (4m,)

    # ---- pack everything into ONE f32 slab (one HBM->VMEM DMA) ----
    width = max(4 * m, n, 8)
    off_w1 = 0
    off_cm = _align8(off_w1 + 2 * n)
    off_wh = _align8(off_cm + 2 * m)
    off_em = _align8(off_wh + m)
    off_rw = _align8(off_em + vocab)
    rows = _align8(off_rw + 6)
    pslab = np.zeros((rows, width), np.float32)
    pslab[off_w1:off_w1 + 2 * n, :4 * m] = W1
    pslab[off_cm:off_cm + 2 * m, :m] = Cm
    pslab[off_wh:off_wh + m, :3 * m] = WhhT
    pslab[off_em:off_em + vocab, :n] = emb
    pslab[off_rw + 0, :4 * m] = b1
    pslab[off_rw + 1, :m] = float(b_convm)
    pslab[off_rw + 2, :3 * m] = bhh
    pslab[off_rw + 3, :m] = w_ht[0]
    pslab[off_rw + 4, :m] = w_ct[0, :m]
    pslab[off_rw + 5, 0] = float(b_ht)
    pslab[off_rw + 5, 1] = float(b_ct)
    pslab[off_rw + 5, 2] = float(w_ct[0, m])

    params = dict(n=n, m=m, vocab=vocab,
                  off=dict(w1=off_w1, cm=off_cm, whh=off_wh, emb=off_em, rows=off_rw),
                  pslab=jnp.asarray(pslab))

    raw = dict(C1=C1, C2=C2, Cm=Cm, Cx=Cx,
               b_c1=float(b_conv1), b_c2=float(b_conv2),
               b_cm=float(b_convm), b_cx=float(b_convx),
               Wih=wih, Whh=whh, bih=bih, bhh=bhh,
               w_ht=w_ht, b_ht=float(b_ht), w_ct=w_ct, b_ct=float(b_ct), emb=emb)
    raw = {k: (jnp.asarray(v) if isinstance(v, np.ndarray) else v) for k, v in raw.items()}
    return params, raw


# ---------------- pure-JAX f32 references (unfolded weights) ----------------

def _shift_left_zero(st1, da_t, n):
    da_i = da_t.astype(jnp.int32)[:, None]
    padded = jnp.concatenate([st1, jnp.zeros_like(st1)], axis=1)
    idx = jnp.clip(jnp.arange(n)[None, :] + da_i, 0, 2 * n - 1)
    return jnp.take_along_axis(padded, idx, axis=1)


def st_head_reference(raw, ht, st1, da_t):
    """it / srt / ct / shift / st from a given GRU state."""
    n = st1.shape[1]
    vocab = raw["emb"].shape[0]
    da_f = da_t.astype(jnp.float32)[:, None]
    logit = ht @ raw["w_ht"].T + raw["b_ht"]
    it = jnp.floor((vocab - 1) * jax.nn.sigmoid(logit[:, 0])).astype(jnp.int32)
    srt = raw["emb"][it]
    ct = jax.nn.sigmoid(jnp.maximum(jnp.concatenate([ht, da_f], axis=1), 0.0)
                        @ raw["w_ct"].T + raw["b_ct"])
    return _shift_left_zero(st1, da_t, n) * ct + srt


def reference_forward(raw, st1, ht1, zt, da_t):
    m = ht1.shape[1]
    da_f = da_t.astype(jnp.float32)[:, None]
    y1 = st1 @ raw["C1"] + raw["b_c1"]
    mt1_0 = y1 @ raw["C2"] + raw["b_c2"]
    Ht1 = (jnp.maximum(jnp.concatenate([mt1_0, ht1], axis=1), 0.0)
           @ raw["Cm"] + raw["b_cm"])
    xt = jnp.concatenate([zt, da_f], axis=1) @ raw["Cx"] + raw["b_cx"]
    gi = xt @ raw["Wih"].T + raw["bih"]
    gh = Ht1 @ raw["Whh"].T + raw["bhh"]
    r = jax.nn.sigmoid(gi[:, :m] + gh[:, :m])
    z = jax.nn.sigmoid(gi[:, m:2 * m] + gh[:, m:2 * m])
    ng = jnp.tanh(gi[:, 2 * m:] + r * gh[:, 2 * m:])
    ht = (1.0 - z) * ng + z * Ht1
    st = st_head_reference(raw, ht, st1, da_t)
    return st, ht


if __name__ == "__main__":
    B, n, m, vocab = 2, 16, 8, 10      # round((n-2)/(m-1)) = 2; all shapes line up

    params, raw = make_params(n, m, vocab)

    key = jax.random.PRNGKey(0)
    k1, k2, k3, k4 = jax.random.split(key, 4)
    st1 = jax.random.normal(k1, (B, n), dtype=jnp.float32)
    ht1 = jax.random.normal(k2, (B, m), dtype=jnp.float32)
    zt = jax.random.normal(k3, (B, n - 1), dtype=jnp.float32)
    da_t = jax.random.randint(k4, (B,), 0, n, dtype=jnp.int32)

    st, ht = generator_cell(params, st1, ht1, zt, da_t)
    st, ht = jax.block_until_ready((st, ht))

    assert st.shape == (B, n) and ht.shape == (B, m)
    assert bool(jnp.all(jnp.isfinite(st))) and bool(jnp.all(jnp.isfinite(ht)))

    # ---- correctness checks (f32 folded weights -> tight tolerances) ----
    st_ref, ht_ref = reference_forward(raw, st1, ht1, zt, da_t)
    assert bool(jnp.allclose(ht, ht_ref, atol=5e-2, rtol=5e-2)), \
        "GRU state mismatch vs pure-JAX reference"

    # st head path checked against a reference driven by the kernel's own ht:
    # this validates it/srt/ct/shift/scale exactly, without flakiness if the
    # discrete index it = floor((V-1)*sigmoid(.)) sits on a rounding boundary.
    st_hyb = st_head_reference(raw, ht, st1, da_t)
    assert bool(jnp.allclose(st, st_hyb, atol=2e-2, rtol=2e-2)), \
        "st head mismatch vs reference driven by kernel ht"

    # Full end-to-end st check as well, whenever the discrete index agrees
    # between the kernel and the reference GRU state (it essentially always does).
    def _it_of(h):
        lg = h @ raw["w_ht"].T + raw["b_ht"]
        return jnp.floor((vocab - 1) * jax.nn.sigmoid(lg[:, 0])).astype(jnp.int32)
    if bool(jnp.all(_it_of(ht) == _it_of(ht_ref))):
        assert bool(jnp.allclose(st, st_ref, atol=5e-2, rtol=5e-2)), \
            "st mismatch vs full pure-JAX reference"

    print("KERNEL_OK")
</pallas_src>

<mosaic_0001>
module attributes {stable_mosaic.version = 11 : i64} {
  func.func @kernel(%arg0: memref<2x40xf32, #tpu.memory_space<vmem>>, %arg1: memref<80x32xf32, #tpu.memory_space<vmem>>, %arg2: memref<2x24xf32, #tpu.memory_space<vmem>>) attributes {dimension_semantics = [], scalar_prefetch = 0 : i64, scratch_operands = 0 : i64, tpu.core_type = #tpu.core_type<tc>} {
    %c0 = arith.constant 0 : index
    %c0_0 = arith.constant 0 : index
    %0 = vector.load %arg0[%c0, %c0_0] : memref<2x40xf32, #tpu.memory_space<vmem>>, vector<2x32xf32>
    %c0_1 = arith.constant 0 : index
    %c0_2 = arith.constant 0 : index
    %1 = vector.load %arg0[%c0_1, %c0_2] : memref<2x40xf32, #tpu.memory_space<vmem>>, vector<2x16xf32>
    %c0_3 = arith.constant 0 : index
    %c31 = arith.constant 31 : index
    %2 = vector.load %arg0[%c0_3, %c31] : memref<2x40xf32, #tpu.memory_space<vmem>>, vector<2x1xf32>
    %c0_4 = arith.constant 0 : index
    %c32 = arith.constant 32 : index
    %3 = vector.load %arg0[%c0_4, %c32] : memref<2x40xf32, #tpu.memory_space<vmem>>, vector<2x8xf32>
    %c0_5 = arith.constant 0 : index
    %c0_6 = arith.constant 0 : index
    %4 = vector.load %arg1[%c0_5, %c0_6] : memref<80x32xf32, #tpu.memory_space<vmem>>, vector<32x32xf32>
    %c32_7 = arith.constant 32 : index
    %c0_8 = arith.constant 0 : index
    %5 = vector.load %arg1[%c32_7, %c0_8] : memref<80x32xf32, #tpu.memory_space<vmem>>, vector<16x8xf32>
    %c48 = arith.constant 48 : index
    %c0_9 = arith.constant 0 : index
    %6 = vector.load %arg1[%c48, %c0_9] : memref<80x32xf32, #tpu.memory_space<vmem>>, vector<8x24xf32>
    %c56 = arith.constant 56 : index
    %c0_10 = arith.constant 0 : index
    %7 = vector.load %arg1[%c56, %c0_10] : memref<80x32xf32, #tpu.memory_space<vmem>>, vector<10x16xf32>
    %c72 = arith.constant 72 : index
    %c0_11 = arith.constant 0 : index
    %8 = vector.load %arg1[%c72, %c0_11] : memref<80x32xf32, #tpu.memory_space<vmem>>, vector<1x32xf32>
    %c73 = arith.constant 73 : index
    %c0_12 = arith.constant 0 : index
    %9 = vector.load %arg1[%c73, %c0_12] : memref<80x32xf32, #tpu.memory_space<vmem>>, vector<1x8xf32>
    %c74 = arith.constant 74 : index
    %c0_13 = arith.constant 0 : index
    %10 = vector.load %arg1[%c74, %c0_13] : memref<80x32xf32, #tpu.memory_space<vmem>>, vector<1x24xf32>
    %c75 = arith.constant 75 : index
    %c0_14 = arith.constant 0 : index
    %11 = vector.load %arg1[%c75, %c0_14] : memref<80x32xf32, #tpu.memory_space<vmem>>, vector<1x8xf32>
    %c76 = arith.constant 76 : index
    %c0_15 = arith.constant 0 : index
    %12 = vector.load %arg1[%c76, %c0_15] : memref<80x32xf32, #tpu.memory_space<vmem>>, vector<1x8xf32>
    %c77 = arith.constant 77 : index
    %c0_16 = arith.constant 0 : index
    %13 = vector.load %arg1[%c77, %c0_16] : memref<80x32xf32, #tpu.memory_space<vmem>>, vector<1x1xf32>
    %c77_17 = arith.constant 77 : index
    %c1 = arith.constant 1 : index
    %14 = vector.load %arg1[%c77_17, %c1] : memref<80x32xf32, #tpu.memory_space<vmem>>, vector<1x1xf32>
    %c77_18 = arith.constant 77 : index
    %c2 = arith.constant 2 : index
    %15 = vector.load %arg1[%c77_18, %c2] : memref<80x32xf32, #tpu.memory_space<vmem>>, vector<1x1xf32>
    %cst = arith.constant dense<0.000000e+00> : vector<2x32xf32>
    %16 = tpu.matmul %0, %4, %cst {dimension_numbers = #tpu.dot_dimension_numbers<[1], [0], [0], [1], [0, 0, 1, 1], [], []>} : vector<2x32xf32>, vector<32x32xf32>, vector<2x32xf32> -> vector<2x32xf32>
    %17 = vector.broadcast %8 : vector<1x32xf32> to vector<2x32xf32>
    %18 = arith.addf %16, %17 : vector<2x32xf32>
    %19 = vector.extract_strided_slice %18 {offsets = [0, 0], sizes = [2, 8], strides = [1, 1]} : vector<2x32xf32> to vector<2x8xf32>
    %20 = vector.extract_strided_slice %18 {offsets = [0, 8], sizes = [2, 24], strides = [1, 1]} : vector<2x32xf32> to vector<2x24xf32>
    %21 = tpu.concatenate %19, %3 in 1 : vector<2x8xf32>, vector<2x8xf32> -> vector<2x16xf32>
    %cst_19 = arith.constant 0.000000e+00 : f32
    %22 = vector.broadcast %cst_19 : f32 to vector<2x16xf32>
    %23 = arith.maximumf %21, %22 : vector<2x16xf32>
    %cst_20 = arith.constant dense<0.000000e+00> : vector<2x8xf32>
    %24 = tpu.matmul %23, %5, %cst_20 {dimension_numbers = #tpu.dot_dimension_numbers<[1], [0], [0], [1], [0, 0, 1, 1], [], []>} : vector<2x16xf32>, vector<16x8xf32>, vector<2x8xf32> -> vector<2x8xf32>
    %25 = vector.broadcast %9 : vector<1x8xf32> to vector<2x8xf32>
    %26 = arith.addf %24, %25 : vector<2x8xf32>
    %cst_21 = arith.constant dense<0.000000e+00> : vector<2x24xf32>
    %27 = tpu.matmul %26, %6, %cst_21 {dimension_numbers = #tpu.dot_dimension_numbers<[1], [0], [0], [1], [0, 0, 1, 1], [], []>} : vector<2x8xf32>, vector<8x24xf32>, vector<2x24xf32> -> vector<2x24xf32>
    %28 = vector.broadcast %10 : vector<1x24xf32> to vector<2x24xf32>
    %29 = arith.addf %27, %28 : vector<2x24xf32>
    %30 = vector.extract_strided_slice %20 {offsets = [0, 0], sizes = [2, 8], strides = [1, 1]} : vector<2x24xf32> to vector<2x8xf32>
    %31 = vector.extract_strided_slice %29 {offsets = [0, 0], sizes = [2, 8], strides = [1, 1]} : vector<2x24xf32> to vector<2x8xf32>
    %32 = arith.addf %30, %31 : vector<2x8xf32>
    %33 = arith.negf %32 : vector<2x8xf32>
    %34 = math.exp %33 : vector<2x8xf32>
    %cst_22 = arith.constant 1.000000e+00 : f32
    %35 = vector.broadcast %cst_22 : f32 to vector<2x8xf32>
    %36 = arith.addf %35, %34 : vector<2x8xf32>
    %37 = arith.divf %35, %36 : vector<2x8xf32>
    %38 = vector.extract_strided_slice %20 {offsets = [0, 8], sizes = [2, 8], strides = [1, 1]} : vector<2x24xf32> to vector<2x8xf32>
    %39 = vector.extract_strided_slice %29 {offsets = [0, 8], sizes = [2, 8], strides = [1, 1]} : vector<2x24xf32> to vector<2x8xf32>
    %40 = arith.addf %38, %39 : vector<2x8xf32>
    %41 = arith.negf %40 : vector<2x8xf32>
    %42 = math.exp %41 : vector<2x8xf32>
    %cst_23 = arith.constant 1.000000e+00 : f32
    %43 = vector.broadcast %cst_23 : f32 to vector<2x8xf32>
    %44 = arith.addf %43, %42 : vector<2x8xf32>
    %45 = arith.divf %43, %44 : vector<2x8xf32>
    %46 = vector.extract_strided_slice %20 {offsets = [0, 16], sizes = [2, 8], strides = [1, 1]} : vector<2x24xf32> to vector<2x8xf32>
    %47 = vector.extract_strided_slice %29 {offsets = [0, 16], sizes = [2, 8], strides = [1, 1]} : vector<2x24xf32> to vector<2x8xf32>
    %48 = arith.mulf %37, %47 : vector<2x8xf32>
    %49 = arith.addf %46, %48 : vector<2x8xf32>
    %50 = math.tanh %49 : vector<2x8xf32>
    %cst_24 = arith.constant 1.000000e+00 : f32
    %51 = vector.broadcast %cst_24 : f32 to vector<2x8xf32>
    %52 = arith.subf %51, %45 : vector<2x8xf32>
    %53 = arith.mulf %52, %50 : vector<2x8xf32>
    %54 = arith.mulf %45, %26 : vector<2x8xf32>
    %55 = arith.addf %53, %54 : vector<2x8xf32>
    %56 = vector.broadcast %11 : vector<1x8xf32> to vector<2x8xf32>
    %57 = arith.mulf %55, %56 : vector<2x8xf32>
    %cst_25 = arith.constant dense<0.000000e+00> : vector<2xf32>
    %58 = vector.multi_reduction <add>, %57, %cst_25 [1] : vector<2x8xf32> to vector<2xf32>
    %59 = vector.shape_cast %58 : vector<2xf32> to vector<2x1xf32>
    %60 = vector.broadcast %13 : vector<1x1xf32> to vector<2x1xf32>
    %61 = arith.addf %59, %60 : vector<2x1xf32>
    %62 = arith.negf %61 : vector<2x1xf32>
    %63 = math.exp %62 : vector<2x1xf32>
    %cst_26 = arith.constant 1.000000e+00 : f32
    %64 = vector.broadcast %cst_26 : f32 to vector<2x1xf32>
    %65 = arith.addf %64, %63 : vector<2x1xf32>
    %66 = arith.divf %64, %65 : vector<2x1xf32>
    %cst_27 = arith.constant 9.000000e+00 : f32
    %67 = vector.broadcast %cst_27 : f32 to vector<2x1xf32>
    %68 = arith.mulf %67, %66 : vector<2x1xf32>
    %69 = math.floor %68 : vector<2x1xf32>
    %70 = arith.fptosi %69 : vector<2x1xf32> to vector<2x1xi32>
    %cst_28 = arith.constant 0.000000e+00 : f32
    %71 = vector.broadcast %cst_28 : f32 to vector<2x8xf32>
    %72 = arith.maximumf %55, %71 : vector<2x8xf32>
    %73 = vector.broadcast %12 : vector<1x8xf32> to vector<2x8xf32>
    %74 = arith.mulf %72, %73 : vector<2x8xf32>
    %cst_29 = arith.constant dense<0.000000e+00> : vector<2xf32>
    %75 = vector.multi_reduction <add>, %74, %cst_29 [1] : vector<2x8xf32> to vector<2xf32>
    %76 = vector.shape_cast %75 : vector<2xf32> to vector<2x1xf32>
    %cst_30 = arith.constant 0.000000e+00 : f32
    %77 = vector.broadcast %cst_30 : f32 to vector<2x1xf32>
    %78 = arith.maximumf %2, %77 : vector<2x1xf32>
    %79 = vector.broadcast %15 : vector<1x1xf32> to vector<2x1xf32>
    %80 = arith.mulf %78, %79 : vector<2x1xf32>
    %81 = arith.addf %76, %80 : vector<2x1xf32>
    %82 = vector.broadcast %14 : vector<1x1xf32> to vector<2x1xf32>
    %83 = arith.addf %81, %82 : vector<2x1xf32>
    %84 = arith.negf %83 : vector<2x1xf32>
    %85 = math.exp %84 : vector<2x1xf32>
    %cst_31 = arith.constant 1.000000e+00 : f32
    %86 = vector.broadcast %cst_31 : f32 to vector<2x1xf32>
    %87 = arith.addf %86, %85 : vector<2x1xf32>
    %88 = arith.divf %86, %87 : vector<2x1xf32>
    %89 = tpu.iota {dimensions = array<i32: 1>} : vector<2x10xi32>
    %90 = vector.broadcast %70 : vector<2x1xi32> to vector<2x10xi32>
    %91 = arith.cmpi eq, %89, %90 : vector<2x10xi32>
    %92 = arith.extui %91 : vector<2x10xi1> to vector<2x10xi32>
    %93 = arith.sitofp %92 : vector<2x10xi32> to vector<2x10xf32>
    %cst_32 = arith.constant dense<0.000000e+00> : vector<2x16xf32>
    %94 = tpu.matmul %93, %7, %cst_32 {dimension_numbers = #tpu.dot_dimension_numbers<[1], [0], [0], [1], [0, 0, 1, 1], [], []>} : vector<2x10xf32>, vector<10x16xf32>, vector<2x16xf32> -> vector<2x16xf32>
    %95 = arith.fptosi %2 : vector<2x1xf32> to vector<2x1xi32>
    %96 = tpu.iota {dimensions = array<i32: 1>} : vector<2x16x16xi32>
    %97 = tpu.iota {dimensions = array<i32: 2>} : vector<2x16x16xi32>
    %98 = vector.shape_cast %95 : vector<2x1xi32> to vector<2x1x1xi32>
    %99 = vector.broadcast %98 : vector<2x1x1xi32> to vector<2x16x16xi32>
    %100 = arith.addi %96, %99 : vector<2x16x16xi32>
    %101 = arith.cmpi eq, %97, %100 : vector<2x16x16xi32>
    %102 = arith.extui %101 : vector<2x16x16xi1> to vector<2x16x16xi32>
    %103 = arith.sitofp %102 : vector<2x16x16xi32> to vector<2x16x16xf32>
    %104 = vector.shape_cast %1 : vector<2x16xf32> to vector<2x1x16xf32>
    %105 = vector.broadcast %104 : vector<2x1x16xf32> to vector<2x16x16xf32>
    %106 = arith.mulf %105, %103 : vector<2x16x16xf32>
    %cst_33 = arith.constant dense<0.000000e+00> : vector<2x16xf32>
    %107 = vector.multi_reduction <add>, %106, %cst_33 [2] : vector<2x16x16xf32> to vector<2x16xf32>
    %108 = vector.broadcast %88 : vector<2x1xf32> to vector<2x16xf32>
    %109 = arith.mulf %107, %108 : vector<2x16xf32>
    %110 = arith.addf %109, %94 : vector<2x16xf32>
    %111 = tpu.concatenate %110, %55 in 1 : vector<2x16xf32>, vector<2x8xf32> -> vector<2x24xf32>
    %c0_34 = arith.constant 0 : index
    %c0_35 = arith.constant 0 : index
    %112 = vector.load %arg2[%c0_34, %c0_35] : memref<2x24xf32, #tpu.memory_space<vmem>>, vector<2x24xf32>
    tpu.vector_store %arg2[%c0_34, %c0_35], %111 {strides = array<i32>} : memref<2x24xf32, #tpu.memory_space<vmem>>, vector<2x24xf32>,
    return
  }
}

</mosaic_0001>

<bundles_post_ra>
// kernel: tpu_custom_call.1
= control target key start
LH: loop header
LB: loop body
LE: loop exit
PB: predicated region body
PF: predicated region fallthrough
CT: control target
= control target key end

     0   :  { %s501_s17 = smov 104   ;;  %s621_s0 = inlined_call_operand.vmem [shape: f32[2,40], index: 0, kind: input, shape index: {}]   ;;  %s622_s1 = inlined_call_operand.vmem [shape: f32[80,32], index: 1, kind: input, shape index: {}]   ;;  %s623_s2 = inlined_call_operand.hbm [shape: f32[2,24], index: 2, kind: output, shape index: {}]  }
   0x1   :  { %v16_v0 = vld [vmem:[%s622_s1 + $0x18] sm:$0xff]  ;;  %v15_v1 = vld [vmem:[%s622_s1 + $0x10] sm:$0xff]  ;;  %v536_v2 = vld [vmem:[%s621_s0] sm:$0x3] }
   0x2   :  { %45 = vmatpush.msra.mxu0 %v16_v0  ;;  %v14_v3 = vld [vmem:[%s622_s1 + $0x8] sm:$0xff]  ;;  %53 = vrot.lane.b32.xlu0 %v536_v2, %s501_s17  ;;  %v13_v4 = vld [vmem:[%s622_s1] sm:$0xff] }
   0x4   :  { %46 = vmatpush.msra.mxu0 %v15_v1 }
   0x5   :  { %7 = vsyncpa [#allocation3], 0  ;;  %vm29_vm0 = vcmask 261120   ;;  %v18_v5 = vld [vmem:[%s622_s1 + $0x28] sm:$0xff]  ;;  %v17_v6 = vld [vmem:[%s622_s1 + $0x20] sm:$0xff]  ;;  %vm56_vm1 = vcmask 64512  }
   0x6   :  { %47 = vmatpush.msra.mxu0 %v14_v3  ;;  %78 = vmatpush.msra.mxu1 %v18_v5  ;;  %v455_v7 = vld [vmem:[%s622_s1 + $0x48] ss:$0 sm:$0xff]  ;;  %vm60_vm2 = vcmask 130048   ;;  %v19_v13 = vld [vmem:[%s622_s1 + $0x30] sm:$0xff]  ;;  %v456_v14 = vld [vmem:[%s622_s1 + $0x49] ss:$0 sm:$0xff]  ;;  %v430_v3 = vceil.f32 %v536_v2 }
   0x7   :  { %103 = vmatpush.msra.mxu2 %v19_v13  ;;  %v457_v17 = vld [vmem:[%s622_s1 + $0x4a] ss:$0 sm:$0xff]  ;;  %s502_s3 = smov 120   ;;  %s503_s4 = smov 8   ;;  %v458_v22 = vld [vmem:[%s622_s1 + $0x4b] ss:$0 sm:$0xff] }
   0x8   :  { %48 = vmatpush.msra.mxu0 %v13_v4  ;;  %79 = vmatpush.msra.mxu1 %v17_v6  ;;  %s504_s7 = smov 16   ;;  %s505_s8 = smov 112   ;;  %v459_v49 = vld [vmem:[%s622_s1 + $0x4c] ss:$0 sm:$0xff]  ;;  %vm163_vm7 = vcmask 58368   ;;  %v506_v55 = vmov 0   ;;  %v431_v4 = vfloor.f32 %v536_v2 }
   0x9   :  { %414 = vmatmul.msk.f32.vlgmr.msra.gmra.mxu0 %vm29_vm0, %v536_v2  ;;  %445 = vset.pattern.permute.xlu0 %v506_v55  ;;  %v460_v56 = vld [vmem:[%s622_s1 + $0x4d] ss:$0 sm:$0xff]  ;;  %vm429_vm8 = vcmp.lt.s32.totalorder %v536_v2, 0  ;;  %v507_v5 = vmov 31   ;;  %s508_s13 = smov 29   ;;  %s509_s14 = smov 30  }
   0xa   :  { %447 = vset.pattern.permute.xlu2 %v507_v5  ;;  %vm247_vm13 = vcmask 1041408   ;;  %vm243_vm14 = vcmask 80896   ;;  %s405_s21 = sshll.u32 %s623_s2, 4  ;;  %s406_s21 = int_to_ptr.hbm [resolvable:$true] %s405_s21 }
  0x74   :  { %v54_v9 = vpop.permute.xlu0 %53 }
  0x86   :  { %v50_v8 = vpop.f32.mrf.mxu0 }
  0x87   :  { %v51_v10 = vadd.f32 %v455_v7, %v50_v8  ;;  %v432_v8 = vsel %vm429_vm8, %v430_v3, %v431_v4 }
  0x89   :  { %v57_v11 = vsel %vm56_vm1, %v51_v10, %v54_v9 }
  0x8a   :  { %v58_v12 = vmax.f32 %v57_v11, 0.0 }
  0x8c   :  { %415 = vmatmul.msk.f32.vlgmr.msra.gmra.mxu1 %vm60_vm2, %v58_v12  ;;  %v433_v12 = vcvt.f32.s32 %v432_v8 }
 0x109   :  { %v81_v15 = vpop.f32.mrf.mxu1 }
 0x10a   :  { %v82_v16 = vadd.f32 %v456_v14, %v81_v15  ;;  %v275_v15 = vrot.slane %v433_v12, 1 }
 0x10c   :  { %416 = vmatmul.msk.f32.vlgmr.msra.gmra.mxu2 %vm56_vm1, %v82_v16 }
 0x18f   :  { %v105_v18 = vpop.f32.mrf.mxu2 }
 0x190   :  { %v106_v19 = vadd.f32 %v457_v17, %v105_v18  ;;  %v277_v18 = vperm.slane %v275_v15, 0 }
 0x192   :  { %132 = vrot.lane.b32.xlu1 %v106_v19, %s502_s3  ;;  %109 = vrot.lane.b32.xlu0 %v106_v19, %s503_s4 }
 0x19a   :  { %155 = vrot.lane.b32.xlu0 %v458_v22, %s504_s7  ;;  %v21_v22 = vld [vmem:[%s622_s1 + $0x40] sm:$0x3] }
 0x19b   :  { %421 = vmatpush.msk.msra.mxu3 %vm247_vm13, %v21_v22 }
 0x204   :  { %v110_v20 = vpop.permute.xlu0 %109  ;;  %v133_v35 = vpop.permute.xlu1 %132 }
 0x205   :  { %v112_v21 = vadd.f32 %v110_v20, %v51_v10 }
 0x207   :  { %v417_v23 = vmul.f32 -1.442695, %v112_v21  ;;  %v276_v21 = vperm.slane %v433_v12, 0 }
 0x209   :  { %461 = vpow2.f32 %v417_v23  ;;  %v20_v23 = vld [vmem:[%s622_s1 + $0x38] sm:$0xff]  ;;  %s511_s1 = smov [#allocation2]  }
 0x20a   :  { %266 = vmatpush.msra.mxu3 %v20_v23  ;;  %s403_s19 = sshll.u32 %s511_s1, 4  ;;  %s404_s19 = int_to_ptr.vmem [resolvable:$true] %s403_s19 }
 0x20c   :  { %v156_v46 = vpop.permute.xlu0 %155 }
 0x20f   :  { %v462_v24 = vpop.eup %461 }
 0x210   :  { %v116_v25 = vadd.f32 1.0, %v462_v24  ;;  %v235_v24 = vlaneseq }
 0x212   :  { %463 = vrcp.f32 %v116_v25  ;;  %v128_v29 = vand.u32 2147483648, %v116_v25  ;;  %v126_v31 = vand.u32 2147483647, %v116_v25  ;;  %vm122_vm4 = vweird.f32 %v116_v25 }
 0x214   :  { %v129_v33 = vor.u32 1.1754944e-38, %v128_v29  ;;  %vm127_vm6 = vcmp.eq.f32.partialorder %v126_v31, 8.507059e+37 }
 0x218   :  { %v464_v26 = vpop.eup %463 }
 0x219   :  { %v118_v27 = vmul.f32 %v464_v26, %v116_v25  ;;  %vm123_vm3 = vweird.f32 %v464_v26  ;;  %v596_v25 = vand.u32 127, %v235_v24 }
 0x21a   :  { %vm124_vm5 = vmor %vm122_vm4, %vm123_vm3 }
 0x21b   :  { %v119_v28 = vsub.f32 1.0, %v118_v27 }
 0x21d   :  { %v120_v30 = vmul.f32 %v464_v26, %v119_v28  ;;  %v300_v28 = vrot.slane %v536_v2, 1 }
 0x21f   :  { %v121_v32 = vadd.f32 %v464_v26, %v120_v30  ;;  %v302_v31 = vperm.slane %v300_v28, 0 }
 0x221   :  { %v125_v34 = vsel %vm124_vm5, %v464_v26, %v121_v32  ;;  %v273_v26 = vshrl.u32 %v235_v24, 7 }
 0x222   :  { %v130_v36 = vsel %vm127_vm6, %v129_v33, %v125_v34  ;;  %v510_v33 = vmov 0.0  }
 0x223   :  { %v135_v37 = vmul.f32 %v133_v35, %v130_v36  ;;  %v142_v42 = vsub.f32 1.0, %v130_v36  ;;  %448 = vset.pattern.permute.xlu1 %v273_v26  ;;  %v274_v32 = vadd.s32 8, %v273_v26 }
 0x225   :  { %137 = vrot.lane.b32.xlu1 %v135_v37, %s504_s7 }
 0x297   :  { %v138_v38 = vpop.permute.xlu1 %137 }
 0x298   :  { %v140_v39 = vadd.f32 %v138_v38, %v51_v10 }
 0x29a   :  { %465 = vtanh.f32 %v140_v39  ;;  %v205_v39 = vmax.f32 %v536_v2, 0.0 }
 0x2a0   :  { %v466_v40 = vpop.eup %465 }
 0x2a1   :  { %144 = vrot.lane.b32.xlu2 %v466_v40, %s502_s3 }
 0x2a9   :  { %148 = vrot.lane.b32.xlu2 %v82_v16, %s504_s7 }
 0x2fb   :  { %v145_v41 = vpop.permute.xlu2 %144 }
 0x2fc   :  { %v147_v44 = vmul.f32 %v145_v41, %v142_v42 }
 0x303   :  { %v149_v43 = vpop.permute.xlu2 %148 }
 0x304   :  { %v151_v45 = vmul.f32 %v149_v43, %v130_v36 }
 0x306   :  { %v573_v47 = vadd.f32 %v151_v45, %v147_v44 }
 0x308   :  { %v158_v48 = vmul.f32 %v156_v46, %v573_v47  ;;  %v191_v52 = vmax.f32 %v573_v47, 0.0 }
 0x30a   :  { %160 = vrot.lane.b32.xlu1 %v158_v48, %s505_s8 }
 0x312   :  { %194 = vrot.lane.b32.xlu1 %v459_v49, %s504_s7 }
 0x37c   :  { %v161_v50 = vpop.permute.xlu1 %160 }
 0x37d   :  { %v164_v51 = vsel %vm163_vm7, %v161_v50, 0.0 }
 0x37e   :  { %165 = vadd.xlane.f32.xlu2 %v164_v51 }
 0x384   :  { %v195_v53 = vpop.permute.xlu1 %194 }
 0x385   :  { %v197_v54 = vmul.f32 %v195_v53, %v191_v52 }
 0x387   :  { %199 = vrot.lane.b32.xlu1 %v197_v54, %s505_s8  ;;  %v301_v54 = vperm.slane %v536_v2, 0 }
 0x396   :  { %282 = vperm.xlu2 %447, %v277_v18  }
 0x39e   :  { %450 = vset.pattern.permute.xlu2 %v273_v26 }
 0x3f1   :  { %v166_v57 = vpop.xlane.xlu2 %165 }
 0x3f2   :  { %v168_v58 = vadd.f32 %v460_v56, %v166_v57 }
 0x3f4   :  { %v418_v59 = vmul.f32 -1.442695, %v168_v58 }
 0x3f6   :  { %467 = vpow2.f32 %v418_v59 }
 0x3f9   :  { %v200_v60 = vpop.permute.xlu1 %199  ;;  %v283_v27 = vpop.permute.xlu2 %282 }
 0x3fa   :  { %v202_v61 = vsel %vm163_vm7, %v200_v60, 0.0  ;;  %v286_v30 = vadd.s32 %v283_v27, %v273_v26  ;;  %v287_v37 = vadd.s32 %v283_v27, %v274_v32 }
 0x3fb   :  { %203 = vadd.xlane.f32.xlu1 %v202_v61 }
 0x3fc   :  { %v468_v62 = vpop.eup %467  ;;  %vm290_vm0 = vcmp.eq.s32.totalorder %v596_v25, %v286_v30  ;;  %vm291_vm1 = vcmp.eq.s32.totalorder %v596_v25, %v287_v37 }
 0x3fd   :  { %v172_v63 = vadd.f32 1.0, %v468_v62  ;;  %v425_v35 = vsel %vm290_vm0, 1.0, %v510_v33  ;;  %v426_v42 = vsel %vm291_vm1, 1.0, %v510_v33 }
 0x3fe   :  { %v307_v36 = vmul.f32 %v425_v35, %v302_v31  ;;  %v308_v43 = vmul.f32 %v426_v42, %v302_v31 }
 0x3ff   :  { %469 = vrcp.f32 %v172_v63  ;;  %v184_v7 = vand.u32 2147483648, %v172_v63  ;;  %v182_v10 = vand.u32 2147483647, %v172_v63  ;;  %vm178_vm10 = vweird.f32 %v172_v63 }
 0x400   :  { %v315_v38 = vsel %vm60_vm2, %v307_v36, 0.0  ;;  %v318_v46 = vsel %vm60_vm2, %v308_v43, 0.0 }
 0x401   :  { %v185_v13 = vor.u32 1.1754944e-38, %v184_v7  ;;  %vm183_vm12 = vcmp.eq.f32.partialorder %v182_v10, 8.507059e+37 }
 0x403   :  { %316 = vadd.xlane.f32.xlu1 %v315_v38 }
 0x405   :  { %v470_v0 = vpop.eup %469 }
 0x406   :  { %v174_v1 = vmul.f32 %v470_v0, %v172_v63  ;;  %vm179_vm9 = vweird.f32 %v470_v0 }
 0x407   :  { %vm180_vm11 = vmor %vm178_vm10, %vm179_vm9  ;;  %vm387_vm9 = vcmask 130112   ;;  %vm392_vm10 = vcmask 1041409  }
 0x408   :  { %v175_v6 = vsub.f32 1.0, %v174_v1 }
 0x40a   :  { %v176_v9 = vmul.f32 %v470_v0, %v175_v6 }
 0x40b   :  { %319 = vadd.xlane.f32.xlu1 %v318_v46 }
 0x40c   :  { %v177_v11 = vadd.f32 %v470_v0, %v176_v9 }
 0x40e   :  { %v181_v14 = vsel %vm180_vm11, %v470_v0, %v177_v11  ;;  %vm396_vm11 = vcmask 189440  }
 0x40f   :  { %v186_v16 = vsel %vm183_vm12, %v185_v13, %v181_v14 }
 0x410   :  { %v188_v17 = vmul.f32 9.0, %v186_v16 }
 0x412   :  { %v189_v19 = vfloor.f32 %v188_v17 }
 0x414   :  { %v428_v20 = vcvt.f32.s32 %v189_v19 }
 0x416   :  { %238 = vperm.xlu0 %445, %v428_v20  }
 0x41e   :  { %207 = vrot.lane.b32.xlu0 %v460_v56, %s508_s13 }
 0x41f   :  { %446 = vset.pattern.permute.xlu0 %v507_v5 }
 0x426   :  { %212 = vrot.lane.b32.xlu0 %v460_v56, %s509_s14 }
 0x42e   :  { %279 = vperm.xlu0 %446, %v276_v21  }
 0x46e   :  { %v204_v44 = vpop.xlane.xlu1 %203 }
 0x476   :  { %v317_v16 = vpop.xlane.xlu1 %316 }
 0x47e   :  { %v320_v20 = vpop.xlane.xlu1 %319 }
 0x488   :  { %v239_v29 = vpop.permute.xlu0 %238 }
 0x489   :  { %vm240_vm15 = vcmp.eq.s32.totalorder %v596_v25, %v239_v29 }
 0x48a   :  { %v420_v34 = vsel %vm240_vm15, 1.0, %v510_v33 }
 0x48b   :  { %422 = vmatmul.msk.f32.vlgmr.msra.gmra.mxu3 %vm243_vm14, %v420_v34  ;;  %v385_v34 = vadd.s32 4294967288, %v596_v25 }
 0x490   :  { %v208_v40 = vpop.permute.xlu0 %207 }
 0x491   :  { %v210_v41 = vmul.f32 %v208_v40, %v205_v39 }
 0x493   :  { %v211_v45 = vadd.f32 %v210_v41, %v204_v44 }
 0x498   :  { %v213_v48 = vpop.permute.xlu0 %212 }
 0x499   :  { %v215_v49 = vadd.f32 %v213_v48, %v211_v45 }
 0x49b   :  { %v419_v50 = vmul.f32 -1.442695, %v215_v49 }
 0x49d   :  { %471 = vpow2.f32 %v419_v50 }
 0x4a0   :  { %v280_v51 = vpop.permute.xlu0 %279 }
 0x4a1   :  { %v284_v52 = vadd.s32 %v280_v51, %v273_v26  ;;  %v285_v53 = vadd.s32 %v280_v51, %v274_v32 }
 0x4a3   :  { %v472_v56 = vpop.eup %471  ;;  %vm288_vm3 = vcmp.eq.s32.totalorder %v596_v25, %v284_v52  ;;  %vm289_vm4 = vcmp.eq.s32.totalorder %v596_v25, %v285_v53 }
 0x4a4   :  { %v219_v57 = vadd.f32 1.0, %v472_v56  ;;  %v424_v58 = vsel %vm289_vm4, 1.0, %v510_v33  ;;  %v423_v59 = vsel %vm288_vm3, 1.0, %v510_v33 }
 0x4a5   :  { %v306_v60 = vmul.f32 %v424_v58, %v301_v54  ;;  %v305_v8 = vmul.f32 %v423_v59, %v301_v54 }
 0x4a6   :  { %473 = vrcp.f32 %v219_v57  ;;  %v231_v1 = vand.u32 2147483648, %v219_v57  ;;  %v229_v2 = vand.u32 2147483647, %v219_v57  ;;  %vm225_vm6 = vweird.f32 %v219_v57 }
 0x4a7   :  { %v312_v61 = vsel %vm60_vm2, %v306_v60, 0.0  ;;  %v309_v9 = vsel %vm60_vm2, %v305_v8, 0.0 }
 0x4a8   :  { %313 = vadd.xlane.f32.xlu2 %v312_v61  ;;  %v232_v5 = vor.u32 1.1754944e-38, %v231_v1  ;;  %vm230_vm8 = vcmp.eq.f32.partialorder %v229_v2, 8.507059e+37 }
 0x4ac   :  { %v474_v62 = vpop.eup %473 }
 0x4ad   :  { %v221_v63 = vmul.f32 %v474_v62, %v219_v57  ;;  %vm226_vm5 = vweird.f32 %v474_v62 }
 0x4ae   :  { %vm227_vm7 = vmor %vm225_vm6, %vm226_vm5 }
 0x4af   :  { %v222_v0 = vsub.f32 1.0, %v221_v63 }
 0x4b1   :  { %v223_v3 = vmul.f32 %v474_v62, %v222_v0 }
 0x4b3   :  { %v224_v4 = vadd.f32 %v474_v62, %v223_v3 }
 0x4b5   :  { %v228_v6 = vsel %vm227_vm7, %v474_v62, %v224_v4 }
 0x4b6   :  { %v233_v7 = vsel %vm230_vm8, %v232_v5, %v228_v6 }
 0x4b7   :  { %323 = vperm.xlu0 %446, %v233_v7  }
 0x4bf   :  { %449 = vset.pattern.permute.xlu0 %v274_v32 }
 0x4e1   :  { %310 = vadd.xlane.f32.xlu0 %v309_v9 }
 0x50e   :  { %v268_v10 = vpop.f32.mrf.mxu3 }
 0x50f   :  { %v334_v11 = vperm.slane %v268_v10, 0  ;;  %v347_v12 = vperm.slane %v268_v10, 1 }
 0x511   :  { %352 = vperm.xlu2 %450, %v347_v12   ;;  %339 = vperm.xlu1 %448, %v334_v11  }
 0x512   :  { %345 = vperm.xlu0 %449, %v334_v11  }
 0x519   :  { %451 = vset.pattern.permute.xlu1 %v274_v32  ;;  %453 = vset.pattern.permute.xlu2 %v506_v55 }
 0x51a   :  { %454 = vset.pattern.permute.xlu0 %v506_v55 }
 0x51b   :  { %v314_v14 = vpop.xlane.xlu2 %313 }
 0x521   :  { %358 = vperm.xlu1 %451, %v347_v12  }
 0x529   :  { %452 = vset.pattern.permute.xlu1 %v506_v55  ;;  %v324_v13 = vpop.permute.xlu0 %323 }
 0x52a   :  { %v326_v15 = vperm.slane %v324_v13, 1  ;;  %v325_v22 = vperm.slane %v324_v13, 0 }
 0x52c   :  { %v331_v17 = vmul.f32 %v326_v15, %v317_v16  ;;  %v330_v28 = vmul.f32 %v325_v22, %v314_v14  ;;  %v332_v55 = vmul.f32 %v326_v15, %v320_v20 }
 0x554   :  { %v311_v21 = vpop.xlane.xlu0 %310 }
 0x555   :  { %v329_v23 = vmul.f32 %v325_v22, %v311_v21 }
 0x56b   :  { %v353_v18 = vpop.permute.xlu2 %352 }
 0x56c   :  { %v366_v19 = vadd.f32 %v353_v18, %v331_v17 }
 0x56e   :  { %379 = vperm.xlu2 %453, %v366_v19  }
 0x583   :  { %v340_v24 = vpop.permute.xlu1 %339 }
 0x584   :  { %v364_v26 = vadd.f32 %v340_v24, %v329_v23  ;;  %v346_v27 = vpop.permute.xlu0 %345 }
 0x585   :  { %v365_v29 = vadd.f32 %v346_v27, %v330_v28 }
 0x586   :  { %373 = vperm.xlu1 %452, %v364_v26  }
 0x58e   :  { %376 = vperm.xlu1 %452, %v365_v29  }
 0x593   :  { %v359_v30 = vpop.permute.xlu1 %358 }
 0x594   :  { %v367_v31 = vadd.f32 %v359_v30, %v332_v55 }
 0x596   :  { %382 = vperm.xlu1 %452, %v367_v31  }
 0x5c8   :  { %v380_v35 = vpop.permute.xlu2 %379 }
 0x5c9   :  { %v389_v38 = vperm.slane %v380_v35, %v596_v25 }
 0x5f8   :  { %v374_v32 = vpop.permute.xlu1 %373 }
 0x5f9   :  { %v384_v39 = vperm.slane %v374_v32, %v596_v25 }
 0x600   :  { %v377_v33 = vpop.permute.xlu1 %376 }
 0x601   :  { %v386_v36 = vperm.slane %v377_v33, %v385_v34 }
 0x603   :  { %v388_v41 = vsel %vm387_vm9, %v386_v36, %v384_v39 }
 0x608   :  { %v383_v37 = vpop.permute.xlu1 %382 }
 0x609   :  { %v390_v40 = vperm.slane %v383_v37, %v385_v34 }
 0x60b   :  { %v391_v42 = vsel %vm387_vm9, %v390_v40, %v389_v38 }
 0x60c   :  { %v393_v43 = vsel %vm392_vm10, %v391_v42, %v388_v41 }
 0x60d   :  { %v395_v44 = vsel %vm60_vm2, %v393_v43, %v573_v47 }
 0x60e   :  { %397 = vst.msk [vmem:[#allocation2] sm:$0x3] %vm396_vm11, %v395_v44 }
 0x60f   :  { %408 = dma.vmem_to_hbm [thread:$0]  %s404_s19, 32, %s406_s21, [#allocation3]  }
 0x610   :  { %499 = dma.done.wait [#allocation3], 32  }
 0x611   :  { %500 = vsyncadd [#allocation3], 4294967264 }
 0x612   :  { %413 = vsyncpa [#allocation3], 1 }

</bundles_post_ra>
